<compile_context>
chip_gen: v5e
topology: v5e:2x2
jax: 0.10.0
libtpu: 0.0.40
codegen_flags: <defaults>
</compile_context>

<pallas_src>
import jax
import jax.numpy as jnp
from jax.experimental import pallas as pl
from jax.experimental.pallas import tpu as pltpu


STATE_DIM = 5
HIDDEN = 32
ACTION_DIM = 3
LANE = 128  # TPU lane width; batch tiles must be a multiple of this.


def _dqn_kernel(x_ref, w1_ref, b1_ref, w2_ref, b2_ref, w3_ref, b3_ref, o_ref):
    """Fused forward on one batch tile (batch on the lane axis).

    x_ref: (STATE_DIM, TILE_B)       o_ref: (ACTION_DIM, TILE_B)
    w*_ref: (out, in)                b*_ref: (out, 1) broadcast along lanes
    """
    x = x_ref[...]

    h1 = jnp.dot(w1_ref[...], x, preferred_element_type=jnp.float32) + b1_ref[...]
    h1 = jnp.maximum(h1, 0.0)

    h2 = jnp.dot(w2_ref[...], h1, preferred_element_type=jnp.float32) + b2_ref[...]
    h2 = jnp.maximum(h2, 0.0)

    out = jnp.dot(w3_ref[...], h2, preferred_element_type=jnp.float32) + b3_ref[...]
    o_ref[...] = out.astype(o_ref.dtype)


def dqn_forward(x, params, tile_b=8192):
    """x: (B, STATE_DIM) float32 -> (B, ACTION_DIM) float32."""
    w1, b1, w2, b2, w3, b3 = params
    B = x.shape[0]

    # Pad the batch to a lane-aligned multiple of the tile size (zeros are
    # harmless: padded columns are computed and then sliced off).
    b_lane = pl.cdiv(B, LANE) * LANE
    tile = min(tile_b, b_lane)            # tile is a multiple of 128
    b_padded = pl.cdiv(b_lane, tile) * tile
    grid = (b_padded // tile,)

    # Transpose so batch is on the lane axis, and pad.
    xt = jnp.pad(x.T, ((0, 0), (0, b_padded - B)))

    # Biases as (out, 1) so they broadcast along lanes inside the kernel.
    b1c = b1.reshape(HIDDEN, 1)
    b2c = b2.reshape(HIDDEN, 1)
    b3c = b3.reshape(ACTION_DIM, 1)

    const = lambda i: (0, 0)  # weights/biases: one block, resident across grid steps

    out_t = pl.pallas_call(
        _dqn_kernel,
        out_shape=jax.ShapeDtypeStruct((ACTION_DIM, b_padded), jnp.float32),
        grid=grid,
        in_specs=[
            pl.BlockSpec((STATE_DIM, tile), lambda i: (0, i)),   # x tile
            pl.BlockSpec((HIDDEN, STATE_DIM), const),            # W1
            pl.BlockSpec((HIDDEN, 1), const),                    # b1
            pl.BlockSpec((HIDDEN, HIDDEN), const),               # W2
            pl.BlockSpec((HIDDEN, 1), const),                    # b2
            pl.BlockSpec((ACTION_DIM, HIDDEN), const),           # W3
            pl.BlockSpec((ACTION_DIM, 1), const),                # b3
        ],
        out_specs=pl.BlockSpec((ACTION_DIM, tile), lambda i: (0, i)),
        compiler_params=pltpu.CompilerParams(
            dimension_semantics=("parallel",),        # megacore on v7x
            vmem_limit_bytes=32 * 1024 * 1024,        # plenty; usage is a few MB
        ),
    )(xt, w1, b1c, w2, b2c, w3, b3c)

    return out_t[:, :B].T


def init_params(key):
    """Deterministic init mirroring nn.Linear's U(-1/sqrt(fan_in), 1/sqrt(fan_in)).

    Layout matches PyTorch: W is (out_features, in_features), b is (out_features,).
    """
    def linear(key, fan_in, fan_out):
        kw, kb = jax.random.split(key)
        bound = 1.0 / jnp.sqrt(float(fan_in))
        w = jax.random.uniform(kw, (fan_out, fan_in), jnp.float32, -bound, bound)
        b = jax.random.uniform(kb, (fan_out,), jnp.float32, -bound, bound)
        return w, b

    k1, k2, k3 = jax.random.split(key, 3)
    w1, b1 = linear(k1, STATE_DIM, HIDDEN)
    w2, b2 = linear(k2, HIDDEN, HIDDEN)
    w3, b3 = linear(k3, HIDDEN, ACTION_DIM)
    return (w1, b1, w2, b2, w3, b3)


def reference_forward(x, params):
    w1, b1, w2, b2, w3, b3 = params
    h1 = jnp.maximum(x @ w1.T + b1, 0.0)
    h2 = jnp.maximum(h1 @ w2.T + b2, 0.0)
    return h2 @ w3.T + b3


if __name__ == "__main__":
    # NOTE: at tiny batch (B=4) plain XLA beats any custom kernel; the Pallas
    # path pays off for batched-environment inference with B in the thousands.
    key = jax.random.PRNGKey(0)
    k_params, k_x = jax.random.split(key)

    params = init_params(k_params)
    x = jax.random.normal(k_x, (4, STATE_DIM), jnp.float32)  # batch=4 states

    out = dqn_forward(x, params)
    out = jax.block_until_ready(out)

    ref = reference_forward(x, params)
    assert out.shape == (4, ACTION_DIM)
    assert jnp.allclose(out, ref, atol=1e-5, rtol=1e-5)

    # Also exercise a multi-tile batch to validate the grid / padding path.
    x_big = jax.random.normal(k_x, (300, STATE_DIM), jnp.float32)
    out_big = jax.block_until_ready(dqn_forward(x_big, params, tile_b=128))
    assert out_big.shape == (300, ACTION_DIM)
    assert jnp.allclose(out_big, reference_forward(x_big, params), atol=1e-5, rtol=1e-5)

    print("KERNEL_OK")
</pallas_src>

<mosaic_0001>
module attributes {stable_mosaic.version = 11 : i64} {
  func.func @_dqn_kernel(%arg0: i32, %arg1: memref<5x128xf32, #tpu.memory_space<vmem>>, %arg2: memref<32x5xf32, #tpu.memory_space<vmem>>, %arg3: memref<32x1xf32, #tpu.memory_space<vmem>>, %arg4: memref<32x32xf32, #tpu.memory_space<vmem>>, %arg5: memref<32x1xf32, #tpu.memory_space<vmem>>, %arg6: memref<3x32xf32, #tpu.memory_space<vmem>>, %arg7: memref<3x1xf32, #tpu.memory_space<vmem>>, %arg8: memref<3x128xf32, #tpu.memory_space<vmem>>) attributes {dimension_semantics = [#tpu.dimension_semantics<parallel>], iteration_bounds = array<i64: 1>, scalar_prefetch = 0 : i64, scratch_operands = 0 : i64, tpu.core_type = #tpu.core_type<tc>, window_params = [{transform_indices = @transform_0, window_bounds = array<i64: 5, 128>}, {pipeline_mode = #tpu.pipeline_mode<synchronous>, transform_indices = @transform_1, window_bounds = array<i64: 32, 5>}, {pipeline_mode = #tpu.pipeline_mode<synchronous>, transform_indices = @transform_2, window_bounds = array<i64: 32, 1>}, {pipeline_mode = #tpu.pipeline_mode<synchronous>, transform_indices = @transform_3, window_bounds = array<i64: 32, 32>}, {pipeline_mode = #tpu.pipeline_mode<synchronous>, transform_indices = @transform_4, window_bounds = array<i64: 32, 1>}, {pipeline_mode = #tpu.pipeline_mode<synchronous>, transform_indices = @transform_5, window_bounds = array<i64: 3, 32>}, {pipeline_mode = #tpu.pipeline_mode<synchronous>, transform_indices = @transform_6, window_bounds = array<i64: 3, 1>}, {transform_indices = @transform_7, window_bounds = array<i64: 3, 128>}]} {
    %c0 = arith.constant 0 : index
    %c0_0 = arith.constant 0 : index
    %0 = vector.load %arg1[%c0, %c0_0] : memref<5x128xf32, #tpu.memory_space<vmem>>, vector<5x128xf32>
    %c0_1 = arith.constant 0 : index
    %c0_2 = arith.constant 0 : index
    %1 = vector.load %arg2[%c0_1, %c0_2] : memref<32x5xf32, #tpu.memory_space<vmem>>, vector<32x5xf32>
    %cst = arith.constant dense<0.000000e+00> : vector<32x128xf32>
    %2 = tpu.matmul %1, %0, %cst {dimension_numbers = #tpu.dot_dimension_numbers<[1], [0], [0], [1], [0, 0, 1, 1], [], []>} : vector<32x5xf32>, vector<5x128xf32>, vector<32x128xf32> -> vector<32x128xf32>
    %c0_3 = arith.constant 0 : index
    %c0_4 = arith.constant 0 : index
    %3 = vector.load %arg3[%c0_3, %c0_4] : memref<32x1xf32, #tpu.memory_space<vmem>>, vector<32x1xf32>
    %4 = vector.broadcast %3 : vector<32x1xf32> to vector<32x128xf32>
    %5 = arith.addf %2, %4 : vector<32x128xf32>
    %cst_5 = arith.constant 0.000000e+00 : f32
    %6 = vector.broadcast %cst_5 : f32 to vector<32x128xf32>
    %7 = arith.maximumf %5, %6 : vector<32x128xf32>
    %c0_6 = arith.constant 0 : index
    %c0_7 = arith.constant 0 : index
    %8 = vector.load %arg4[%c0_6, %c0_7] : memref<32x32xf32, #tpu.memory_space<vmem>>, vector<32x32xf32>
    %cst_8 = arith.constant dense<0.000000e+00> : vector<32x128xf32>
    %9 = tpu.matmul %8, %7, %cst_8 {dimension_numbers = #tpu.dot_dimension_numbers<[1], [0], [0], [1], [0, 0, 1, 1], [], []>} : vector<32x32xf32>, vector<32x128xf32>, vector<32x128xf32> -> vector<32x128xf32>
    %c0_9 = arith.constant 0 : index
    %c0_10 = arith.constant 0 : index
    %10 = vector.load %arg5[%c0_9, %c0_10] : memref<32x1xf32, #tpu.memory_space<vmem>>, vector<32x1xf32>
    %11 = vector.broadcast %10 : vector<32x1xf32> to vector<32x128xf32>
    %12 = arith.addf %9, %11 : vector<32x128xf32>
    %cst_11 = arith.constant 0.000000e+00 : f32
    %13 = vector.broadcast %cst_11 : f32 to vector<32x128xf32>
    %14 = arith.maximumf %12, %13 : vector<32x128xf32>
    %c0_12 = arith.constant 0 : index
    %c0_13 = arith.constant 0 : index
    %15 = vector.load %arg6[%c0_12, %c0_13] : memref<3x32xf32, #tpu.memory_space<vmem>>, vector<3x32xf32>
    %cst_14 = arith.constant dense<0.000000e+00> : vector<3x128xf32>
    %16 = tpu.matmul %15, %14, %cst_14 {dimension_numbers = #tpu.dot_dimension_numbers<[1], [0], [0], [1], [0, 0, 1, 1], [], []>} : vector<3x32xf32>, vector<32x128xf32>, vector<3x128xf32> -> vector<3x128xf32>
    %c0_15 = arith.constant 0 : index
    %c0_16 = arith.constant 0 : index
    %17 = vector.load %arg7[%c0_15, %c0_16] : memref<3x1xf32, #tpu.memory_space<vmem>>, vector<3x1xf32>
    %18 = vector.broadcast %17 : vector<3x1xf32> to vector<3x128xf32>
    %19 = arith.addf %16, %18 : vector<3x128xf32>
    %c0_17 = arith.constant 0 : index
    %c0_18 = arith.constant 0 : index
    %20 = vector.load %arg8[%c0_17, %c0_18] : memref<3x128xf32, #tpu.memory_space<vmem>>, vector<3x128xf32>
    tpu.vector_store %arg8[%c0_17, %c0_18], %19 {strides = array<i32>} : memref<3x128xf32, #tpu.memory_space<vmem>>, vector<3x128xf32>,
    return
  }
  func.func @transform_0(%arg0: i32) -> (i32, i32) {
    %c0_i32 = arith.constant 0 : i32
    %c0_i32_0 = arith.constant 0 : i32
    return %c0_i32, %arg0 : i32, i32
  }
  func.func @transform_1(%arg0: i32) -> (i32, i32) {
    %c0_i32 = arith.constant 0 : i32
    %c0_i32_0 = arith.constant 0 : i32
    %c0_i32_1 = arith.constant 0 : i32
    return %c0_i32, %c0_i32_0 : i32, i32
  }
  func.func @transform_2(%arg0: i32) -> (i32, i32) {
    %c0_i32 = arith.constant 0 : i32
    %c0_i32_0 = arith.constant 0 : i32
    %c0_i32_1 = arith.constant 0 : i32
    return %c0_i32, %c0_i32_0 : i32, i32
  }
  func.func @transform_3(%arg0: i32) -> (i32, i32) {
    %c0_i32 = arith.constant 0 : i32
    %c0_i32_0 = arith.constant 0 : i32
    %c0_i32_1 = arith.constant 0 : i32
    return %c0_i32, %c0_i32_0 : i32, i32
  }
  func.func @transform_4(%arg0: i32) -> (i32, i32) {
    %c0_i32 = arith.constant 0 : i32
    %c0_i32_0 = arith.constant 0 : i32
    %c0_i32_1 = arith.constant 0 : i32
    return %c0_i32, %c0_i32_0 : i32, i32
  }
  func.func @transform_5(%arg0: i32) -> (i32, i32) {
    %c0_i32 = arith.constant 0 : i32
    %c0_i32_0 = arith.constant 0 : i32
    %c0_i32_1 = arith.constant 0 : i32
    return %c0_i32, %c0_i32_0 : i32, i32
  }
  func.func @transform_6(%arg0: i32) -> (i32, i32) {
    %c0_i32 = arith.constant 0 : i32
    %c0_i32_0 = arith.constant 0 : i32
    %c0_i32_1 = arith.constant 0 : i32
    return %c0_i32, %c0_i32_0 : i32, i32
  }
  func.func @transform_7(%arg0: i32) -> (i32, i32) {
    %c0_i32 = arith.constant 0 : i32
    %c0_i32_0 = arith.constant 0 : i32
    return %c0_i32, %arg0 : i32, i32
  }
}

</mosaic_0001>

<bundles_post_ra>
// kernel: tpu_custom_call.1
= control target key start
LH: loop header
LB: loop body
LE: loop exit
PB: predicated region body
PF: predicated region fallthrough
CT: control target
= control target key end

     0   :  { %vm69_vm0 = vcmask 1044480   ;;  %vm56_vm1 = vcmask 39936   ;;  %v273_v5 = vmov 0   ;;  %s384_s0 = inlined_call_operand.vmem [shape: f32[5,128], index: 0, kind: input, shape index: {}]   ;;  %s385_s1 = inlined_call_operand.vmem [shape: f32[32,5], index: 1, kind: input, shape index: {}]   ;;  %s386_s2 = inlined_call_operand.vmem [shape: f32[32,1], index: 2, kind: input, shape index: {}]   ;;  %s387_s3 = inlined_call_operand.vmem [shape: f32[32,32], index: 3, kind: input, shape index: {}]   ;;  %s388_s4 = inlined_call_operand.vmem [shape: f32[32,1], index: 4, kind: input, shape index: {}]   ;;  %s389_s5 = inlined_call_operand.vmem [shape: f32[3,32], index: 5, kind: input, shape index: {}]   ;;  %s390_s6 = inlined_call_operand.vmem [shape: f32[3,1], index: 6, kind: input, shape index: {}]   ;;  %s391_s7 = inlined_call_operand.hbm [shape: f32[3,128], index: 7, kind: output, shape index: {}]  }
   0x1   :  { %v27_v0 = vld [vmem:[%s384_s0] sm:$0x1f]  ;;  %v31_v2 = vld [vmem:[%s385_s1 + $0x18] sm:$0xff]  ;;  %v33_v4 = vld [vmem:[%s386_s2 + $0x8] sm:$0xff]  ;;  %245 = vset.pattern.permute.xlu1 %v273_v5  ;;  %244 = vset.pattern.permute.xlu0 %v273_v5 }
   0x2   :  { %v28_v1 = vld [vmem:[%s385_s1] sm:$0xff]  ;;  %227 = vmatpush.msk.msra.mxu0 %vm69_vm0, %v27_v0  ;;  %237 = vmatpush.msk.msra.mxu2 %vm69_vm0, %v27_v0  ;;  %v35_v3 = vld [vmem:[%s386_s2 + $0x18] sm:$0xff] }
   0x3   :  { %228 = vmatmul.msk.f32.vlgmr.msra.gmra.mxu0 %vm56_vm1, %v28_v1  ;;  %231 = vmatmul.msk.f32.vlgmr.msra.gmra.mxu2 %vm56_vm1, %v31_v2 }
   0x4   :  { %53 = vperm.xlu0 %244, %v35_v3   ;;  %43 = vperm.xlu1 %245, %v33_v4  }
   0x5   :  { %12 = vsyncpa [#allocation3], 0  ;;  %246 = vset.pattern.permute.xlu2 %v273_v5  ;;  %v29_v6 = vld [vmem:[%s385_s1 + $0x8] sm:$0xff]  ;;  %v34_v7 = vld [vmem:[%s386_s2 + $0x10] sm:$0xff]  ;;  %vm134_vm2 = vcmask 261120   ;;  %s274_s10 = smov [#allocation2]  }
   0x6   :  { %v32_v8 = vld [vmem:[%s386_s2] sm:$0xff]  ;;  %v30_v9 = vld [vmem:[%s385_s1 + $0x10] sm:$0xff]  ;;  %v111_v10 = vld [vmem:[%s388_s4 + $0x8] sm:$0xff]  ;;  %s216_s0 = sshll.u32 %s274_s10, 4  ;;  %s218_s13 = sshll.u32 %s391_s7, 4  ;;  %s217_s0 = int_to_ptr.vmem [resolvable:$true] %s216_s0  ;;  %s219_s13 = int_to_ptr.hbm [resolvable:$true] %s218_s13 }
   0x7   :  { %v110_v11 = vld [vmem:[%s388_s4] sm:$0xff]  ;;  %v113_v13 = vld [vmem:[%s388_s4 + $0x18] sm:$0xff]  ;;  %v112_v19 = vld [vmem:[%s388_s4 + $0x10] sm:$0xff] }
   0x8   :  { %131 = vperm.xlu2 %246, %v113_v13   ;;  %v181_v24 = vld [vmem:[%s390_s6] sm:$0x7]  ;;  %v108_v32 = vld [vmem:[%s387_s3 + $0x10] sm:$0xff]  ;;  %v107_v33 = vld [vmem:[%s387_s3 + $0x8] sm:$0xff] }
   0x9   :  { %v106_v31 = vld [vmem:[%s387_s3] sm:$0xff]  ;;  %v109_v34 = vld [vmem:[%s387_s3 + $0x18] sm:$0xff] }
   0xa   :  { %v180_v51 = vld [vmem:[%s389_s5] sm:$0x7] }
   0xb   :  { %229 = vmatmul.msk.f32.gmra.mxu0 %vm56_vm1, %v29_v6 }
   0xc   :  { %48 = vperm.xlu0 %244, %v34_v7   ;;  %38 = vperm.xlu1 %245, %v32_v8  }
  0x10   :  { %126 = vperm.xlu2 %246, %v112_v19  }
  0x13   :  { %230 = vmatmul.msk.f32.gmra.mxu0 %vm56_vm1, %v30_v9 }
  0x14   :  { %121 = vperm.xlu0 %244, %v111_v10   ;;  %116 = vperm.xlu1 %245, %v110_v11  }
  0x18   :  { %184 = vperm.xlu2 %246, %v181_v24  }
  0x62   :  { %v132_v35 = vpop.permute.xlu2 %131 }
  0x6a   :  { %v127_v38 = vpop.permute.xlu2 %126 }
  0x72   :  { %v185_v52 = vpop.permute.xlu2 %184 }
  0x76   :  { %v54_v14 = vpop.permute.xlu0 %53  ;;  %v44_v15 = vpop.permute.xlu1 %43 }
  0x7e   :  { %v49_v21 = vpop.permute.xlu0 %48  ;;  %v39_v22 = vpop.permute.xlu1 %38 }
  0x80   :  { %v90_v12 = vpop.f32.mrf.mxu0 }
  0x81   :  { %v91_v27 = vadd.f32 %v90_v12, %v39_v22 }
  0x83   :  { %v102_v30 = vmax.f32 %v91_v27, 0.0 }
  0x86   :  { %v99_v16 = vpop.f32.mrf.mxu2  ;;  %v122_v43 = vpop.permute.xlu0 %121 }
  0x87   :  { %v100_v18 = vadd.f32 %v99_v16, %v54_v14  ;;  %v117_v46 = vpop.permute.xlu1 %116 }
  0x88   :  { %v93_v17 = vpop.f32.mrf.mxu0 }
  0x89   :  { %v105_v20 = vmax.f32 %v100_v18, 0.0  ;;  %v94_v25 = vadd.f32 %v93_v17, %v44_v15 }
  0x8b   :  { %159 = vmatpush.msra.mxu1 %v105_v20  ;;  %238 = vmatpush.msra.mxu3 %v105_v20  ;;  %v103_v29 = vmax.f32 %v94_v25, 0.0 }
  0x90   :  { %v96_v23 = vpop.f32.mrf.mxu0 }
  0x91   :  { %v97_v26 = vadd.f32 %v96_v23, %v49_v21 }
  0x93   :  { %v104_v28 = vmax.f32 %v97_v26, 0.0 }
  0x95   :  { %160 = vmatpush.msra.mxu1 %v104_v28  ;;  %239 = vmatpush.msra.mxu3 %v104_v28 }
  0x97   :  { %161 = vmatpush.msra.mxu1 %v103_v29  ;;  %240 = vmatpush.msra.mxu3 %v103_v29 }
  0x99   :  { %162 = vmatpush.msra.mxu1 %v102_v30  ;;  %241 = vmatpush.msra.mxu3 %v102_v30 }
  0x9a   :  { %232 = vmatmul.msk.f32.vlgmr.msra.gmra.mxu1 %vm134_vm2, %v106_v31  ;;  %234 = vmatmul.msk.f32.vlgmr.msra.gmra.mxu3 %vm134_vm2, %v108_v32 }
  0xa2   :  { %233 = vmatmul.msk.f32.gmra.mxu1 %vm134_vm2, %v107_v33  ;;  %235 = vmatmul.msk.f32.gmra.mxu3 %vm134_vm2, %v109_v34 }
 0x117   :  { %v164_v36 = vpop.f32.mrf.mxu1 }
 0x118   :  { %v165_v47 = vadd.f32 %v164_v36, %v117_v46 }
 0x11a   :  { %v176_v50 = vmax.f32 %v165_v47, 0.0 }
 0x11d   :  { %v170_v37 = vpop.f32.mrf.mxu3 }
 0x11e   :  { %v171_v41 = vadd.f32 %v170_v37, %v127_v38 }
 0x11f   :  { %v167_v39 = vpop.f32.mrf.mxu1 }
 0x120   :  { %v168_v44 = vadd.f32 %v167_v39, %v122_v43  ;;  %v178_v48 = vmax.f32 %v171_v41, 0.0 }
 0x122   :  { %v177_v49 = vmax.f32 %v168_v44, 0.0 }
 0x125   :  { %v173_v40 = vpop.f32.mrf.mxu3 }
 0x126   :  { %v174_v42 = vadd.f32 %v173_v40, %v132_v35 }
 0x128   :  { %v179_v45 = vmax.f32 %v174_v42, 0.0 }
 0x12a   :  { %202 = vmatpush.msrb.mxu2 %v179_v45 }
 0x12c   :  { %203 = vmatpush.msrb.mxu2 %v178_v48 }
 0x12e   :  { %204 = vmatpush.msrb.mxu2 %v177_v49 }
 0x130   :  { %205 = vmatpush.msrb.mxu2 %v176_v50 }
 0x131   :  { %236 = vmatmul.msk.f32.vlgmr.msrb.gmra.mxu2 %vm134_vm2, %v180_v51 }
 0x1b4   :  { %v207_v53 = vpop.f32.mrf.mxu2 }
 0x1b5   :  { %v208_v54 = vadd.f32 %v207_v53, %v185_v52 }
 0x1b7   :  { %210 = vst [vmem:[#allocation2] sm:$0x7] %v208_v54 }
 0x1b8   :  { %221 = dma.vmem_to_hbm [thread:$0]  %s217_s0, 64, %s219_s13, [#allocation3]  }
 0x1b9   :  { %271 = dma.done.wait [#allocation3], 64  }
 0x1ba   :  { %272 = vsyncadd [#allocation3], 4294967232 }
 0x1bb   :  { %226 = vsyncpa [#allocation3], 1 }

</bundles_post_ra>
